<compile_context>
chip_gen: v5e
topology: v5e:2x2
jax: 0.10.0
libtpu: 0.0.40
codegen_flags: <defaults>
</compile_context>

<pallas_src>
import jax
import jax.numpy as jnp
from jax.experimental import pallas as pl
from jax.experimental.pallas import tpu as pltpu


def _round_up(x, m):
    return ((x + m - 1) // m) * m


def _dimchange_kernel(x_ref, w_ref, b_ref, o_ref):
    # x_ref: (tm, H), w_ref: (H, O), b_ref: (1, O), o_ref: (tm, O)
    # Weight is already (H, O), so the MXU contracts x's lane dim against w's
    # sublane dim directly (no in-kernel transpose). Accumulate in f32.
    acc = jnp.dot(x_ref[...], w_ref[...], preferred_element_type=jnp.float32)
    o_ref[...] = (acc + b_ref[...]).astype(o_ref.dtype)


def _vmem_capacity_bytes():
    # Per-core VMEM: 128 MiB on v5e/v6e, 64 MiB on v7x.
    try:
        return int(pltpu.get_tpu_info().vmem_capacity_bytes)
    except Exception:
        return 64 * 2**20  # conservative fallback (v7x)


def dim_change(x, weight, bias, *, tm=None):
    """
    x:      (B, V, H)   float32
    weight: (O, H, 1)   PyTorch Conv1d weight layout (kernel_size=1)
    bias:   (O,)        float32
    returns (B, V, O) == permute -> Conv1d(k=1) -> permute
    """
    B, V, H = x.shape
    O = weight.shape[0]
    M = B * V
    itemsize = jnp.dtype(x.dtype).itemsize

    # No M padding: the ragged last row block is handled by Pallas (partial
    # read, masked writeback), and the (M, O) -> (B, V, O) reshape is free.
    x2d = x.reshape(M, H)
    # One-time tiny wrapper transpose: (O, H) -> (H, O).
    w2d = jnp.transpose(weight[:, :, 0])
    b2d = bias.reshape(1, O)

    # Single-buffer the grid-invariant weight/bias when their footprint is big
    # enough to matter for VMEM; at small H/O the default buffering is free.
    weight_bytes = (H * O + O) * itemsize
    single_buffer_wb = weight_bytes >= (1 << 20)
    w_bufs = 1 if single_buffer_wb else 2

    vmem_cap = _vmem_capacity_bytes()
    budget = (3 * vmem_cap) // 4  # leave headroom for Mosaic internal scratch
    tile_budget = max(1 << 20, budget - w_bufs * weight_bytes)

    if tm is None:
        # >= ~1 MiB of x per grid step amortizes the ~0.35us/step overhead ...
        tm = _round_up(max(8, (1 << 20) // max(1, H * itemsize)), 8)
        # ... but keep the double-buffered x/out tiles inside the VMEM budget.
        per_row = 2 * (H + O) * itemsize
        tm = min(tm, max(8, (tile_budget // per_row) // 8 * 8))
        # v7x megacore: with enough rows, keep >= 2 grid steps so the single
        # "parallel" axis spans both TensorCores (no-op on v5e/v6e).
        if M >= 2048:
            tm = min(tm, _round_up(pl.cdiv(M, 2), 8))
    if tm >= M:
        tm = M  # one full-extent block (legal for any M, even non-multiple of 8)
    else:
        tm = max(8, _round_up(tm, 8))
    grid_m = pl.cdiv(M, tm)

    # Scoped-VMEM limit: never below the live set, capped under physical VMEM.
    vmem_needed = (2 * tm * (H + O) + w_bufs * (H * O + O)) * itemsize
    vmem_limit = int(min(max(vmem_needed + (4 << 20), 32 << 20),
                         vmem_cap - (8 << 20)))

    def _invariant_spec(shape):
        if single_buffer_wb:
            return pl.BlockSpec(shape, lambda i: (0, 0),
                                pipeline_mode=pl.Buffered(1))
        return pl.BlockSpec(shape, lambda i: (0, 0))

    cost = pl.CostEstimate(
        flops=2 * M * H * O,
        transcendentals=0,
        bytes_accessed=itemsize * (M * H + H * O + O + M * O),
    )

    out = pl.pallas_call(
        _dimchange_kernel,
        out_shape=jax.ShapeDtypeStruct((M, O), x.dtype),
        grid_spec=pltpu.PrefetchScalarGridSpec(
            num_scalar_prefetch=0,
            grid=(grid_m,),
            in_specs=[
                pl.BlockSpec((tm, H), lambda i: (i, 0)),  # x row tile (pipelined)
                _invariant_spec((H, O)),                  # weight, resident
                _invariant_spec((1, O)),                  # bias, resident
            ],
            out_specs=pl.BlockSpec((tm, O), lambda i: (i, 0)),
        ),
        compiler_params=pltpu.CompilerParams(
            dimension_semantics=("parallel",),
            vmem_limit_bytes=vmem_limit,
        ),
        cost_estimate=cost,
    )(x2d, w2d, b2d)

    return out.reshape(B, V, O)


def dim_change_ref(x, weight, bias):
    # Pure-JAX reference of the PyTorch forward (permute -> conv1d(k=1) -> permute).
    w2d = weight[:, :, 0]  # (O, H)
    return jnp.einsum("bvh,oh->bvo", x, w2d) + bias[None, None, :]


if __name__ == "__main__":
    key = jax.random.PRNGKey(0)
    k_x, k_w, k_b = jax.random.split(key, 3)

    B, V = 2, 16
    channel_number = 32   # H
    output_number = 48    # O = H + H_add

    x = jax.random.normal(k_x, (B, V, channel_number), dtype=jnp.float32)
    # Deterministic synthetic Conv1d parameters (PyTorch shapes: (O, H, 1), (O,))
    weight = jax.random.normal(
        k_w, (output_number, channel_number, 1), dtype=jnp.float32
    ) * (1.0 / jnp.sqrt(channel_number))
    bias = jax.random.normal(k_b, (output_number,), dtype=jnp.float32) * 0.1

    y = dim_change(x, weight, bias)
    y = jax.block_until_ready(y)

    y_ref = dim_change_ref(x, weight, bias)
    assert y.shape == (B, V, output_number)
    assert jnp.allclose(y, y_ref, atol=1e-5, rtol=1e-5), "mismatch vs reference"

    print("KERNEL_OK")
</pallas_src>

<mosaic_0001>
module attributes {stable_mosaic.version = 11 : i64} {
  func.func @_dimchange_kernel(%arg0: i32, %arg1: memref<32x32xf32, #tpu.memory_space<vmem>>, %arg2: memref<32x48xf32, #tpu.memory_space<vmem>>, %arg3: memref<1x48xf32, #tpu.memory_space<vmem>>, %arg4: memref<32x48xf32, #tpu.memory_space<vmem>>) attributes {dimension_semantics = [#tpu.dimension_semantics<parallel>], iteration_bounds = array<i64: 1>, scalar_prefetch = 0 : i64, scratch_operands = 0 : i64, tpu.core_type = #tpu.core_type<tc>, window_params = [{transform_indices = @transform_0, window_bounds = array<i64: 32, 32>}, {pipeline_mode = #tpu.pipeline_mode<synchronous>, transform_indices = @transform_1, window_bounds = array<i64: 32, 48>}, {pipeline_mode = #tpu.pipeline_mode<synchronous>, transform_indices = @transform_2, window_bounds = array<i64: 1, 48>}, {transform_indices = @transform_3, window_bounds = array<i64: 32, 48>}]} {
    %c0 = arith.constant 0 : index
    %c0_0 = arith.constant 0 : index
    %0 = vector.load %arg1[%c0, %c0_0] : memref<32x32xf32, #tpu.memory_space<vmem>>, vector<32x32xf32>
    %c0_1 = arith.constant 0 : index
    %c0_2 = arith.constant 0 : index
    %1 = vector.load %arg2[%c0_1, %c0_2] : memref<32x48xf32, #tpu.memory_space<vmem>>, vector<32x48xf32>
    %cst = arith.constant dense<0.000000e+00> : vector<32x48xf32>
    %2 = tpu.matmul %0, %1, %cst {dimension_numbers = #tpu.dot_dimension_numbers<[1], [0], [0], [1], [0, 0, 1, 1], [], []>} : vector<32x32xf32>, vector<32x48xf32>, vector<32x48xf32> -> vector<32x48xf32>
    %c0_3 = arith.constant 0 : index
    %c0_4 = arith.constant 0 : index
    %3 = vector.load %arg3[%c0_3, %c0_4] : memref<1x48xf32, #tpu.memory_space<vmem>>, vector<1x48xf32>
    %4 = vector.broadcast %3 : vector<1x48xf32> to vector<32x48xf32>
    %5 = arith.addf %2, %4 : vector<32x48xf32>
    %c0_5 = arith.constant 0 : index
    %c0_6 = arith.constant 0 : index
    %6 = vector.load %arg4[%c0_5, %c0_6] : memref<32x48xf32, #tpu.memory_space<vmem>>, vector<32x48xf32>
    tpu.vector_store %arg4[%c0_5, %c0_6], %5 {strides = array<i32>} : memref<32x48xf32, #tpu.memory_space<vmem>>, vector<32x48xf32>,
    return
  }
  func.func @transform_0(%arg0: i32) -> (i32, i32) {
    %c0_i32 = arith.constant 0 : i32
    %c0_i32_0 = arith.constant 0 : i32
    return %arg0, %c0_i32 : i32, i32
  }
  func.func @transform_1(%arg0: i32) -> (i32, i32) {
    %c0_i32 = arith.constant 0 : i32
    %c0_i32_0 = arith.constant 0 : i32
    %c0_i32_1 = arith.constant 0 : i32
    return %c0_i32, %c0_i32_0 : i32, i32
  }
  func.func @transform_2(%arg0: i32) -> (i32, i32) {
    %c0_i32 = arith.constant 0 : i32
    %c0_i32_0 = arith.constant 0 : i32
    %c0_i32_1 = arith.constant 0 : i32
    return %c0_i32, %c0_i32_0 : i32, i32
  }
  func.func @transform_3(%arg0: i32) -> (i32, i32) {
    %c0_i32 = arith.constant 0 : i32
    %c0_i32_0 = arith.constant 0 : i32
    return %arg0, %c0_i32 : i32, i32
  }
}

</mosaic_0001>

<bundles_post_ra>
// kernel: tpu_custom_call.1
= control target key start
LH: loop header
LB: loop body
LE: loop exit
PB: predicated region body
PF: predicated region fallthrough
CT: control target
= control target key end

     0   :  { %8 = vsyncpa [#allocation3], 0  ;;  %s276_s0 = inlined_call_operand.hbm [shape: f32[32,32], index: 0, kind: input, shape index: {}]   ;;  %s277_s1 = inlined_call_operand.hbm [shape: f32[32,48], index: 1, kind: input, shape index: {}]   ;;  %s278_s2 = inlined_call_operand.vmem [shape: f32[1,48], index: 2, kind: input, shape index: {}]   ;;  %s279_s3 = inlined_call_operand.hbm [shape: f32[32,48], index: 3, kind: output, shape index: {}]  }
   0x1   :  { %9 = vsyncpa [#allocation6], 0 }
   0x2   :  { %10 = vsyncpa [#allocation4], 0  ;;  %s15_s14 = sshll.u32 %s276_s0, 4  ;;  %s226_s15 = smov [#allocation2]   ;;  %s16_s14 = int_to_ptr.hbm [resolvable:$true] %s15_s14 }
   0x3   :  { %s17_s16 = sshll.u32 %s226_s15, 4  ;;  %s28_s19 = sshll.u32 %s277_s1, 4  ;;  %s18_s16 = int_to_ptr.vmem [resolvable:$true] %s17_s16  ;;  %s29_s19 = int_to_ptr.hbm [resolvable:$true] %s28_s19 }
   0x4   :  { %s227_s20 = smov 128   ;;  %s228_s21 = smov 8  }
   0x5   :  { %23 = dma.hbm_to_vmem [thread:$0]  %s16_s14, 512, %s18_s16, [#allocation3], %s227_s20, %s227_s20, %s228_s21  }
   0x6   :  { %s229_s22 = smov [#allocation5]  }
   0x7   :  { %s30_s23 = sshll.u32 %s229_s22, 4  ;;  %s31_s23 = int_to_ptr.vmem [resolvable:$true] %s30_s23 }
   0x8   :  { %36 = dma.hbm_to_vmem [thread:$0]  %s29_s19, 512, %s31_s23, [#allocation6], %s227_s20, %s227_s20, %s228_s21  }
   0x9   :  { %220 = dma.done.wait [#allocation3], 512  }
   0xa   :  { %221 = vsyncadd [#allocation3], 4294966784 }
   0xb   :  { %222 = dma.done.wait [#allocation6], 512  }
   0xc   :  { %223 = vsyncadd [#allocation6], 4294966784  ;;  %v54_v0 = vld [vmem:[#allocation5 + $0x18] sm:$0xff]  ;;  %v53_v1 = vld [vmem:[#allocation5 + $0x10] sm:$0xff]  ;;  %vm59_vm0 = vcmask 261120   ;;  %vm101_vm1 = vcmask 392192  }
   0xd   :  { %131 = vmatpush.msra.mxu2 %v54_v0  ;;  %132 = vmatpush.msra.mxu3 %v54_v0  ;;  %v52_v2 = vld [vmem:[#allocation5 + $0x8] sm:$0xff]  ;;  %v51_v3 = vld [vmem:[#allocation5] sm:$0xff]  ;;  %v49_v4 = vld [vmem:[#allocation2 + $0x10] sm:$0xff]  ;;  %s230_s24 = smov [#allocation7]   ;;  %s112_s28 = sshll.u32 %s279_s3, 4  ;;  %s113_s28 = int_to_ptr.hbm [resolvable:$true] %s112_s28 }
   0xe   :  { %84 = vmatpush.msra.mxu0 %v54_v0  ;;  %130 = vmatpush.msra.mxu1 %v54_v0  ;;  %v50_v5 = vld [vmem:[#allocation2 + $0x18] sm:$0xff]  ;;  %v47_v6 = vld [vmem:[#allocation2] sm:$0xff]  ;;  %v48_v7 = vld [vmem:[#allocation2 + $0x8] sm:$0xff]  ;;  %s110_s25 = sshll.u32 %s230_s24, 4  ;;  %s111_s25 = int_to_ptr.vmem [resolvable:$true] %s110_s25 }
   0xf   :  { %134 = vmatpush.msra.mxu2 %v53_v1  ;;  %135 = vmatpush.msra.mxu3 %v53_v1  ;;  %v147_v8 = vld [vmem:[%s278_s2] ss:$0 sm:$0xff] }
  0x10   :  { %85 = vmatpush.msra.mxu0 %v53_v1  ;;  %133 = vmatpush.msra.mxu1 %v53_v1 }
  0x11   :  { %137 = vmatpush.msra.mxu2 %v52_v2  ;;  %138 = vmatpush.msra.mxu3 %v52_v2 }
  0x12   :  { %86 = vmatpush.msra.mxu0 %v52_v2  ;;  %136 = vmatpush.msra.mxu1 %v52_v2 }
  0x13   :  { %140 = vmatpush.msra.mxu2 %v51_v3  ;;  %141 = vmatpush.msra.mxu3 %v51_v3 }
  0x14   :  { %128 = vmatmul.msk.f32.vlgmr.msra.gmra.mxu2 %vm59_vm0, %v49_v4  ;;  %129 = vmatmul.msk.f32.vlgmr.msra.gmra.mxu3 %vm59_vm0, %v50_v5 }
  0x15   :  { %87 = vmatpush.msra.mxu0 %v51_v3  ;;  %139 = vmatpush.msra.mxu1 %v51_v3 }
  0x16   :  { %126 = vmatmul.msk.f32.vlgmr.msra.gmra.mxu0 %vm59_vm0, %v47_v6  ;;  %127 = vmatmul.msk.f32.vlgmr.msra.gmra.mxu1 %vm59_vm0, %v48_v7 }
  0x93   :  { %v89_v9 = vpop.f32.mrf.mxu0  ;;  %v92_v10 = vpop.f32.mrf.mxu1 }
  0x94   :  { %v90_v11 = vadd.f32 %v147_v8, %v89_v9  ;;  %v93_v12 = vadd.f32 %v147_v8, %v92_v10 }
  0x96   :  { %102 = vst.msk [vmem:[#allocation7] sm:$0xff] %vm101_vm1, %v90_v11 }
  0x97   :  { %103 = vst.msk [vmem:[#allocation7 + $0x8] sm:$0xff] %vm101_vm1, %v93_v12  ;;  %v95_v13 = vpop.f32.mrf.mxu2  ;;  %v98_v14 = vpop.f32.mrf.mxu3 }
  0x98   :  { %v96_v15 = vadd.f32 %v147_v8, %v95_v13  ;;  %v99_v16 = vadd.f32 %v147_v8, %v98_v14 }
  0x9a   :  { %104 = vst.msk [vmem:[#allocation7 + $0x10] sm:$0xff] %vm101_vm1, %v96_v15 }
  0x9b   :  { %105 = vst.msk [vmem:[#allocation7 + $0x18] sm:$0xff] %vm101_vm1, %v99_v16 }
  0x9c   :  { %118 = dma.vmem_to_hbm [thread:$0]  %s111_s25, 512, %s113_s28, [#allocation4], %s227_s20, %s227_s20, %s228_s21  }
  0x9d   :  { %224 = dma.done.wait [#allocation4], 512  }
  0x9e   :  { %225 = vsyncadd [#allocation4], 4294966784 }
  0x9f   :  { %123 = vsyncpa [#allocation3], 1 }
  0xa0   :  { %124 = vsyncpa [#allocation6], 1 }
  0xa1   :  { %125 = vsyncpa [#allocation4], 1 }

</bundles_post_ra>
